<compile_context>
chip_gen: v7x
topology: tpu7x:2x2x1
jax: 0.10.0
libtpu: 0.0.40
codegen_flags: <defaults>
</compile_context>

<pallas_src>
import math
import functools

import jax
import jax.numpy as jnp
from jax.experimental import pallas as pl
from jax.experimental.pallas import tpu as pltpu

_LANES = 128


def _eca_kernel(x_ref, w_ref, o_ref, acc_ref, *, kernel_size, inv_hw):
    # x_ref:   (B_t, C, HW_t) f32 VMEM   -- current spatial tile of the input
    # w_ref:   (k,)           f32 SMEM   -- Conv1d(1,1,k) weight taps
    # o_ref:   (B_t, 1, C)    f32 VMEM   -- attention weights (lane-dense in C)
    # acc_ref: (B_t, C, 128)  f32 VMEM   -- running partial sums (scratch)
    s = pl.program_id(1)

    @pl.when(s == 0)
    def _init():
        acc_ref[...] = jnp.zeros_like(acc_ref)

    # Steady state: accumulate 128-lane-aligned slabs with pure VPU adds; the
    # single cross-lane (XLU) reduction is deferred to the epilogue so the
    # inner loop stays strictly load/DMA-bound.
    xt = x_ref[...]
    hw_t = xt.shape[-1]
    partial = acc_ref[...]
    for i in range(hw_t // _LANES):
        partial = partial + xt[:, :, i * _LANES:(i + 1) * _LANES]
    acc_ref[...] = partial

    @pl.when(s == pl.num_programs(1) - 1)
    def _epilogue():
        n_ch = acc_ref.shape[1]
        pad = (kernel_size - 1) // 2

        # Global average pool: one cross-lane reduce per batch tile.
        pooled = jnp.sum(acc_ref[...], axis=-1) * inv_hw          # (B_t, C)

        # Conv1d(1, 1, k, padding=pad, bias=False) along the channel axis,
        # expressed as a banded (C, C) matmul on the MXU:
        #   band[c_in, c_out] = w[c_in - c_out + pad]   (0 outside the band)
        # Zero padding at the channel boundaries falls out of the band limits,
        # so no concat zero-pad copy and no unaligned lane slices are needed.
        taps = [w_ref[j] for j in range(kernel_size)]             # hoisted SMEM reads
        c_in = jax.lax.broadcasted_iota(jnp.int32, (n_ch, n_ch), 0)
        c_out = jax.lax.broadcasted_iota(jnp.int32, (n_ch, n_ch), 1)
        d = c_in - c_out + pad
        band = jnp.zeros((n_ch, n_ch), dtype=jnp.float32)
        for j in range(kernel_size):
            band = band + jnp.where(d == j, taps[j], 0.0)
        conv = jnp.dot(pooled, band, preferred_element_type=jnp.float32)

        o_ref[...] = jax.nn.sigmoid(conv)[:, None, :]


def eca_forward(x, conv_weight, kernel_size, *, batch_tile=None, spatial_tile=None):
    """x: (B, C, H, W) float32, conv_weight: (kernel_size,) float32.

    Returns (B, C, 1, 1) float32 attention weights, matching the PyTorch module.
    """
    B, C, H, W = x.shape
    HW = H * W
    x3 = x.reshape(B, C, HW).astype(jnp.float32)
    conv_weight = conv_weight.reshape(-1).astype(jnp.float32)

    # ---- tile selection --------------------------------------------------
    # Batch tile: a divisor of B, at most 8, so the batch grid axis can be
    # sharded across TensorCores (megacore on v7x) while keeping blocks small.
    if batch_tile is None:
        b_t = 1
        for d in range(1, min(B, 8) + 1):
            if B % d == 0:
                b_t = d
    else:
        assert B % batch_tile == 0
        b_t = batch_tile

    # Spatial tile: multiple of 128 lanes, sized so one input block is ~8 MiB.
    # 2x (double-buffer) x 8 MiB + the f32 accumulator stays well inside v7x's
    # 64 MiB VMEM and is already near the HBM roofline on v5e/v6e.
    if spatial_tile is None:
        target_block_bytes = 8 * 1024 * 1024
        hw_t = (target_block_bytes // (b_t * C * 4)) // _LANES * _LANES
        hw_t = max(_LANES, min(hw_t, 32 * _LANES))
    else:
        hw_t = max(_LANES, (spatial_tile // _LANES) * _LANES)
    hw_t = min(hw_t, pl.cdiv(HW, _LANES) * _LANES)

    # Zero-pad the spatial axis to a multiple of the tile; zeros do not change
    # the sum and we divide by the true H*W inside the kernel.
    hw_padded = pl.cdiv(HW, hw_t) * hw_t
    if hw_padded != HW:
        x3 = jnp.pad(x3, ((0, 0), (0, 0), (0, hw_padded - HW)))

    grid = (B // b_t, hw_padded // hw_t)

    # ---- VMEM budget & scheduler hint -------------------------------------
    in_block_bytes = b_t * C * hw_t * 4
    acc_bytes = b_t * C * _LANES * 4
    out_bytes = b_t * C * 4
    vmem_limit = 2 * in_block_bytes + acc_bytes + 2 * out_bytes + (4 << 20)
    vmem_limit = int(min(max(vmem_limit, 16 << 20), 64 << 20))

    cost = pl.CostEstimate(
        flops=B * C * HW + 2 * B * C * C,       # streaming adds + banded conv matmul
        transcendentals=B * C,                  # sigmoid
        bytes_accessed=B * C * HW * 4 + B * C * 4 + kernel_size * 4,
    )

    out = pl.pallas_call(
        functools.partial(_eca_kernel, kernel_size=kernel_size, inv_hw=1.0 / HW),
        out_shape=jax.ShapeDtypeStruct((B, 1, C), jnp.float32),
        grid_spec=pltpu.PrefetchScalarGridSpec(
            num_scalar_prefetch=0,
            grid=grid,
            in_specs=[
                pl.BlockSpec((b_t, C, hw_t), lambda b, s: (b, 0, s)),
                pl.BlockSpec(memory_space=pltpu.MemorySpace.SMEM),
            ],
            out_specs=pl.BlockSpec((b_t, 1, C), lambda b, s: (b, 0, 0)),
            scratch_shapes=[pltpu.VMEM((b_t, C, _LANES), jnp.float32)],
        ),
        compiler_params=pltpu.CompilerParams(
            dimension_semantics=("parallel", "arbitrary"),
            vmem_limit_bytes=vmem_limit,
        ),
        cost_estimate=cost,
    )(x3, conv_weight)

    return out.reshape(B, C, 1, 1)


def eca_kernel_size(channels, gamma=2, b=1):
    k = int(abs((math.log(channels, 2) + b) / gamma))
    return k if k % 2 else k + 1


def eca_reference(x, conv_weight, kernel_size):
    """Pure-JAX reference mirroring the PyTorch forward (for sanity check)."""
    B, C, H, W = x.shape
    pad = (kernel_size - 1) // 2
    pooled = jnp.mean(x.reshape(B, C, H * W), axis=-1)  # (B, C)
    padded = jnp.pad(pooled, ((0, 0), (pad, pad)))
    acc = jnp.zeros((B, C), dtype=jnp.float32)
    for j in range(kernel_size):
        acc = acc + conv_weight[j] * padded[:, j:j + C]
    return jax.nn.sigmoid(acc).reshape(B, C, 1, 1)


if __name__ == "__main__":
    # Test 1: basic small shape, single block per batch.
    B, C, H, W = 2, 16, 16, 16          # channels=16 -> kernel_size = 3
    k = eca_kernel_size(C)
    kx, kw = jax.random.split(jax.random.PRNGKey(0))
    x = jax.random.normal(kx, (B, C, H, W), dtype=jnp.float32)
    w = (jax.random.uniform(kw, (k,), dtype=jnp.float32) - 0.5) * (2.0 / math.sqrt(k))
    out = jax.block_until_ready(eca_forward(x, w, k))
    ref = eca_reference(x, w, k)
    assert out.shape == (B, C, 1, 1)
    assert jnp.allclose(out, ref, atol=1e-5, rtol=1e-5)

    # Test 2: multi-tile grid (batch_tiles=2, spatial_tiles=2) to exercise the
    # pl.when init / accumulate / epilogue path and batch-parallel axis.
    B2, C2, H2, W2 = 4, 16, 16, 16
    k2 = eca_kernel_size(C2)
    kx2, kw2 = jax.random.split(jax.random.PRNGKey(1))
    x2 = jax.random.normal(kx2, (B2, C2, H2, W2), dtype=jnp.float32)
    w2 = (jax.random.uniform(kw2, (k2,), dtype=jnp.float32) - 0.5) * (2.0 / math.sqrt(k2))
    out2 = jax.block_until_ready(eca_forward(x2, w2, k2, batch_tile=2, spatial_tile=128))
    assert jnp.allclose(out2, eca_reference(x2, w2, k2), atol=1e-5, rtol=1e-5)

    # Test 3: spatial size not a multiple of 128 (exercises the zero-pad path).
    B3, C3, H3, W3 = 2, 8, 10, 10
    k3 = eca_kernel_size(C3)
    kx3, kw3 = jax.random.split(jax.random.PRNGKey(2))
    x3_ = jax.random.normal(kx3, (B3, C3, H3, W3), dtype=jnp.float32)
    w3 = (jax.random.uniform(kw3, (k3,), dtype=jnp.float32) - 0.5) * (2.0 / math.sqrt(k3))
    out3 = jax.block_until_ready(eca_forward(x3_, w3, k3))
    assert jnp.allclose(out3, eca_reference(x3_, w3, k3), atol=1e-5, rtol=1e-5)

    print("KERNEL_OK")
</pallas_src>

<mosaic_0001>
module attributes {stable_mosaic.version = 11 : i64} {
  func.func @_eca_kernel(%arg0: i32, %arg1: i32, %arg2: memref<2x16x256xf32, #tpu.memory_space<vmem>>, %arg3: memref<3xf32, #tpu.memory_space<smem>>, %arg4: memref<2x1x16xf32, #tpu.memory_space<vmem>>, %arg5: memref<2x16x128xf32, #tpu.memory_space<vmem>>) attributes {dimension_semantics = [#tpu.dimension_semantics<parallel>, #tpu.dimension_semantics<arbitrary>], iteration_bounds = array<i64: 1, 1>, scalar_prefetch = 0 : i64, scratch_operands = 1 : i64, tpu.core_type = #tpu.core_type<tc>, window_params = [{transform_indices = @transform_0, window_bounds = array<i64: 2, 16, 256>}, {transform_indices = @transform_1, window_bounds = array<i64: 3>}, {transform_indices = @transform_2, window_bounds = array<i64: 2, 1, 16>}]} {
    %c0_i32 = arith.constant 0 : i32
    %0 = arith.cmpi eq, %arg1, %c0_i32 : i32
    %1 = arith.extui %0 : i1 to i32
    %c0_i32_0 = arith.constant 0 : i32
    %2 = arith.cmpi ne, %1, %c0_i32_0 : i32
    scf.if %2 {
      %cst = arith.constant 0.000000e+00 : f32
      %13 = vector.broadcast %cst : f32 to vector<2x16x128xf32>
      %c0_11 = arith.constant 0 : index
      %c0_12 = arith.constant 0 : index
      %c0_13 = arith.constant 0 : index
      %14 = vector.load %arg5[%c0_11, %c0_12, %c0_13] : memref<2x16x128xf32, #tpu.memory_space<vmem>>, vector<2x16x128xf32>
      tpu.vector_store %arg5[%c0_11, %c0_12, %c0_13], %13 {strides = array<i32>} : memref<2x16x128xf32, #tpu.memory_space<vmem>>, vector<2x16x128xf32>,
    } else {
    }
    %c0 = arith.constant 0 : index
    %c0_1 = arith.constant 0 : index
    %c0_2 = arith.constant 0 : index
    %3 = vector.load %arg2[%c0, %c0_1, %c0_2] : memref<2x16x256xf32, #tpu.memory_space<vmem>>, vector<2x16x256xf32>
    %c0_3 = arith.constant 0 : index
    %c0_4 = arith.constant 0 : index
    %c0_5 = arith.constant 0 : index
    %4 = vector.load %arg5[%c0_3, %c0_4, %c0_5] : memref<2x16x128xf32, #tpu.memory_space<vmem>>, vector<2x16x128xf32>
    %5 = vector.extract_strided_slice %3 {offsets = [0, 0, 0], sizes = [2, 16, 128], strides = [1, 1, 1]} : vector<2x16x256xf32> to vector<2x16x128xf32>
    %6 = arith.addf %4, %5 : vector<2x16x128xf32>
    %7 = vector.extract_strided_slice %3 {offsets = [0, 0, 128], sizes = [2, 16, 128], strides = [1, 1, 1]} : vector<2x16x256xf32> to vector<2x16x128xf32>
    %8 = arith.addf %6, %7 : vector<2x16x128xf32>
    %c0_6 = arith.constant 0 : index
    %c0_7 = arith.constant 0 : index
    %c0_8 = arith.constant 0 : index
    %9 = vector.load %arg5[%c0_6, %c0_7, %c0_8] : memref<2x16x128xf32, #tpu.memory_space<vmem>>, vector<2x16x128xf32>
    tpu.vector_store %arg5[%c0_6, %c0_7, %c0_8], %8 {strides = array<i32>} : memref<2x16x128xf32, #tpu.memory_space<vmem>>, vector<2x16x128xf32>,
    %c0_i32_9 = arith.constant 0 : i32
    %10 = arith.cmpi eq, %arg1, %c0_i32_9 : i32
    %11 = arith.extui %10 : i1 to i32
    %c0_i32_10 = arith.constant 0 : i32
    %12 = arith.cmpi ne, %11, %c0_i32_10 : i32
    scf.if %12 {
      %c0_11 = arith.constant 0 : index
      %c0_12 = arith.constant 0 : index
      %c0_13 = arith.constant 0 : index
      %13 = vector.load %arg5[%c0_11, %c0_12, %c0_13] : memref<2x16x128xf32, #tpu.memory_space<vmem>>, vector<2x16x128xf32>
      %cst = arith.constant dense<0.000000e+00> : vector<2x16xf32>
      %14 = vector.multi_reduction <add>, %13, %cst [2] : vector<2x16x128xf32> to vector<2x16xf32>
      %cst_14 = arith.constant 3.906250e-03 : f32
      %15 = vector.broadcast %cst_14 : f32 to vector<2x16xf32>
      %16 = arith.mulf %14, %15 : vector<2x16xf32>
      %c0_15 = arith.constant 0 : index
      %17 = memref.load %arg3[%c0_15] : memref<3xf32, #tpu.memory_space<smem>>
      %c1 = arith.constant 1 : index
      %18 = memref.load %arg3[%c1] : memref<3xf32, #tpu.memory_space<smem>>
      %c2 = arith.constant 2 : index
      %19 = memref.load %arg3[%c2] : memref<3xf32, #tpu.memory_space<smem>>
      %20 = tpu.iota {dimensions = array<i32: 0>} : vector<16x16xi32>
      %21 = tpu.iota {dimensions = array<i32: 1>} : vector<16x16xi32>
      %22 = arith.subi %20, %21 : vector<16x16xi32>
      %c1_i32 = arith.constant 1 : i32
      %23 = vector.broadcast %c1_i32 : i32 to vector<16x16xi32>
      %24 = arith.addi %22, %23 : vector<16x16xi32>
      %cst_16 = arith.constant 0.000000e+00 : f32
      %25 = vector.broadcast %cst_16 : f32 to vector<16x16xf32>
      %c0_i32_17 = arith.constant 0 : i32
      %26 = vector.broadcast %c0_i32_17 : i32 to vector<16x16xi32>
      %27 = arith.cmpi eq, %24, %26 : vector<16x16xi32>
      %cst_18 = arith.constant 0.000000e+00 : f32
      %28 = vector.broadcast %17 : f32 to vector<16x16xf32>
      %29 = vector.broadcast %cst_18 : f32 to vector<16x16xf32>
      %30 = arith.select %27, %28, %29 : vector<16x16xi1>, vector<16x16xf32>
      %31 = arith.addf %25, %30 : vector<16x16xf32>
      %c1_i32_19 = arith.constant 1 : i32
      %32 = vector.broadcast %c1_i32_19 : i32 to vector<16x16xi32>
      %33 = arith.cmpi eq, %24, %32 : vector<16x16xi32>
      %cst_20 = arith.constant 0.000000e+00 : f32
      %34 = vector.broadcast %18 : f32 to vector<16x16xf32>
      %35 = vector.broadcast %cst_20 : f32 to vector<16x16xf32>
      %36 = arith.select %33, %34, %35 : vector<16x16xi1>, vector<16x16xf32>
      %37 = arith.addf %31, %36 : vector<16x16xf32>
      %c2_i32 = arith.constant 2 : i32
      %38 = vector.broadcast %c2_i32 : i32 to vector<16x16xi32>
      %39 = arith.cmpi eq, %24, %38 : vector<16x16xi32>
      %cst_21 = arith.constant 0.000000e+00 : f32
      %40 = vector.broadcast %19 : f32 to vector<16x16xf32>
      %41 = vector.broadcast %cst_21 : f32 to vector<16x16xf32>
      %42 = arith.select %39, %40, %41 : vector<16x16xi1>, vector<16x16xf32>
      %43 = arith.addf %37, %42 : vector<16x16xf32>
      %cst_22 = arith.constant dense<0.000000e+00> : vector<2x16xf32>
      %44 = tpu.matmul %16, %43, %cst_22 {dimension_numbers = #tpu.dot_dimension_numbers<[1], [0], [0], [1], [0, 0, 1, 1], [], []>} : vector<2x16xf32>, vector<16x16xf32>, vector<2x16xf32> -> vector<2x16xf32>
      %45 = arith.negf %44 : vector<2x16xf32>
      %46 = math.exp %45 : vector<2x16xf32>
      %cst_23 = arith.constant 1.000000e+00 : f32
      %47 = vector.broadcast %cst_23 : f32 to vector<2x16xf32>
      %48 = arith.addf %47, %46 : vector<2x16xf32>
      %49 = arith.divf %47, %48 : vector<2x16xf32>
      %50 = vector.shape_cast %49 : vector<2x16xf32> to vector<2x1x16xf32>
      %c0_24 = arith.constant 0 : index
      %c0_25 = arith.constant 0 : index
      %c0_26 = arith.constant 0 : index
      %51 = vector.load %arg4[%c0_24, %c0_25, %c0_26] : memref<2x1x16xf32, #tpu.memory_space<vmem>>, vector<2x1x16xf32>
      tpu.vector_store %arg4[%c0_24, %c0_25, %c0_26], %50 {strides = array<i32>} : memref<2x1x16xf32, #tpu.memory_space<vmem>>, vector<2x1x16xf32>,
    } else {
    }
    return
  }
  func.func @transform_0(%arg0: i32, %arg1: i32) -> (i32, i32, i32) {
    %c0_i32 = arith.constant 0 : i32
    %c0_i32_0 = arith.constant 0 : i32
    return %arg0, %c0_i32, %arg1 : i32, i32, i32
  }
  func.func @transform_1(%arg0: i32, %arg1: i32) -> i32 {
    %c0_i32 = arith.constant 0 : i32
    %c0_i32_0 = arith.constant 0 : i32
    return %c0_i32 : i32
  }
  func.func @transform_2(%arg0: i32, %arg1: i32) -> (i32, i32, i32) {
    %c0_i32 = arith.constant 0 : i32
    %c0_i32_0 = arith.constant 0 : i32
    %c0_i32_1 = arith.constant 0 : i32
    return %arg0, %c0_i32, %c0_i32_0 : i32, i32, i32
  }
}

</mosaic_0001>

<bundles_post_ra>
// kernel: tpu_custom_call.1
= control target key start
LH: loop header
LB: loop body
LE: loop exit
PB: predicated region body
PF: predicated region fallthrough
CT: control target
= control target key end

     0   :  { %7 = vsyncpa [#allocation4], 0  ;;  %s429_s0 = inlined_call_operand.hbm [shape: f32[2,16,256], index: 0, kind: input, shape index: {}]   ;;  %s430_s1 = inlined_call_operand.vmem [shape: f32[3], index: 1, kind: input, shape index: {}]   ;;  %s431_s2 = inlined_call_operand.hbm [shape: f32[2,1,16], index: 2, kind: output, shape index: {}]  }
   0x1   :  { %8 = vsyncpa [#allocation6], 0 }
   0x2   :  { %9 = vsyncpa [#allocation5], 0  ;;  %s367_s9 = smov [#allocation3]   ;;  %s28_s13 = sshll.u32 %s430_s1, 4  ;;  %s29_s13 = int_to_ptr.vmem [resolvable:$true] %s28_s13 }
   0x3   :  { %s15_s10 = sshll.u32 %s367_s9, 4  ;;  %s305_s16 = scalar_lea.hbm %s429_s0, 1024  ;;  %s16_s10 = int_to_ptr.vmem [resolvable:$true] %s15_s10 }
   0x4   :  { %p306_p0 = scmp.ne.s32.totalorder %s429_s0, %s305_s16  ;;  %p309_p1 = scmp.lt.u32.totalorder %s305_s16, %s429_s0 }
   0x6   :  { %p311_p2 = pnand %p309_p1, %p306_p0 }
   0x8   :  { %314 = shalt.err (!%p311_p2)
}
   0x9   :  { %s315_s21 = scalar_lea.vmem %s16_s10, 1024  ;;  %p320_p4 = scmp.lt.s32.totalorder %s16_s10, %s16_s10 }
   0xa   :  { %p316_p3 = scmp.ne.s32.totalorder %s16_s10, %s315_s21  ;;  %p321_p5 = scmp.lt.s32.totalorder %s315_s21, %s315_s21 }
   0xc   :  { %p322_p6 = por %p321_p5, %p320_p4 }
   0xe   :  { %p323_p7 = pnand %p322_p6, %p316_p3 }
  0x10   :  { %326 = shalt.err (!%p323_p7)
}
  0x11   :  { %s368_s1 = smov 256   ;;  %s369_s22 = smov 16  }
  0x12   :  { %21 = dma.hbm_to_vmem [thread:$0]  %s429_s0, 1024, %s16_s10, [#allocation4], %s368_s1, %s368_s1, %s369_s22  }
  0x13   :  { %s327_s25 = scalar_lea.vmem %s29_s13, 16  ;;  %p332_p9 = scmp.lt.s32.totalorder %s29_s13, %s29_s13 }
  0x14   :  { %p328_p8 = scmp.ne.s32.totalorder %s29_s13, %s327_s25  ;;  %p333_p10 = scmp.lt.s32.totalorder %s327_s25, %s327_s25 }
  0x16   :  { %p334_p11 = por %p333_p10, %p332_p9 }
  0x18   :  { %p335_p12 = pnand %p334_p11, %p328_p8 }
  0x1a   :  { %338 = shalt.err (!%p335_p12)
}
  0x1b   :  { %s370_s26 = smov [#allocation7]  }
  0x1c   :  { %31 = dma.vmem_to_smem %s29_s13, 16, %s370_s26, [#allocation6]  }
  0x1d   :  { %361 = dma.done.wait [#allocation4], 1024  }
  0x1e   :  { %362 = vsyncadd [#allocation4], 4294966272 }
  0x1f   :  { %363 = dma.done.wait [#allocation6], 16  }
  0x20   :  { %364 = vsyncadd [#allocation6], 4294967280 }
  0x21   :  { %38 = sfence }
  0x22   :  { %v51_v0 = vld [vmem:[#allocation3 + $0x20] sm:$0xff]  ;;  %v52_v1 = vld [vmem:[#allocation3 + $0x28] sm:$0xff]  ;;  %v53_v5 = vld [vmem:[#allocation3 + $0x30] sm:$0xff]  ;;  %v93_v11 = vlaneseq  ;;  %s90_s0 = sld [smem:[#allocation7]]  ;;  %s274_s27 = sld [smem:[#allocation7 + $0x1]]  ;;  %v371_v33 = vmov 0.0|0.0  }
  0x23   :  { %v47_v2 = vld [vmem:[#allocation3] sm:$0xff]  ;;  %v65_v3 = vadd.f32 %v52_v1, %v51_v0  ;;  %v48_v4 = vld [vmem:[#allocation3 + $0x8] sm:$0xff]  ;;  %v54_v6 = vld [vmem:[#allocation3 + $0x38] sm:$0xff]  ;;  %s275_s28 = sld [smem:[#allocation7 + $0x2]]  ;;  %288 = vmatprep.subr.bf16.mxu0 %v371_v33  ;;  %vm372_vm6 = vmmov 0   ;;  %v373_v35 = vmov 0.0  }
  0x24   :  { %v63_v7 = vadd.f32 %v48_v4, %v47_v2  ;;  %v49_v8 = vld [vmem:[#allocation3 + $0x10] sm:$0xff]  ;;  %v50_v9 = vld [vmem:[#allocation3 + $0x18] sm:$0xff]  ;;  %v66_v10 = vadd.f32 %v54_v6, %v53_v5  ;;  %v408_v13 = vshrl.u32 %v93_v11, 7  ;;  %v97_v14 = vand.u32 127, %v93_v11  ;;  %285 = vmatprep.mubr.msk.f32.mxu0 %vm372_vm6, %v373_v35  ;;  %s375_s29 = smov [#allocation8]  }
  0x25   :  { %82 = vadd.xlane.f32.xlu1 %v65_v3  ;;  %v64_v12 = vadd.f32 %v50_v9, %v49_v8  ;;  %vm136_vm7 = vcmask 130112   ;;  %vm147_vm8 = vcmask 1041409   ;;  %vm149_vm9 = vcmask 130048   ;;  %s261_s30 = sshll.u32 %s375_s29, 4  ;;  %s262_s30 = int_to_ptr.vmem [resolvable:$true] %s261_s30 }
  0x26   :  { %78 = vadd.xlane.f32.xlu0 %v63_v7  ;;  %v95_v15 = vadd.s32 8, %v408_v13  ;;  %v98_v16 = vsub.s32 %v408_v13, %v97_v14  ;;  %v131_v36 = vadd.s32 4294967288, %v97_v14  ;;  %v129_v39 = vsub.s32 %v97_v14, %v408_v13  ;;  %s339_s3 = scalar_lea.vmem %s262_s30, 32  ;;  %p344_p0 = scmp.lt.s32.totalorder %s262_s30, %s262_s30 }
  0x27   :  { %v374_v59 = vmov 1966171168   ;;  %vm253_vm10 = vcmask 122880   ;;  %p340_p13 = scmp.ne.s32.totalorder %s262_s30, %s339_s3  ;;  %p345_p1 = scmp.lt.s32.totalorder %s339_s3, %s339_s3 }
  0x28   :  { %v99_v17 = vsub.s32 %v95_v15, %v97_v14  ;;  %v100_v18 = vadd.s32 1, %v98_v16  ;;  %v104_v20 = vstv %s90_s0  ;;  %v111_v23 = vstv %s274_s27 }
  0x29   :  { %84 = vadd.xlane.f32.xlu1 %v66_v10  ;;  %v118_v28 = vstv %s275_s28  ;;  %v134_v41 = vsub.s32 %v131_v36, %v408_v13  ;;  %v230_v60 = vunpack.c.l.s4 %v374_v59  ;;  %p346_p2 = por %p345_p1, %p344_p0 }
  0x2a   :  { %80 = vadd.xlane.f32.xlu0 %v64_v12  ;;  %v101_v19 = vadd.s32 1, %v99_v17  ;;  %vm102_vm0 = vcmp.eq.s32.totalorder %v100_v18, 0  ;;  %vm109_vm2 = vcmp.eq.s32.totalorder %v100_v18, 1  ;;  %vm116_vm4 = vcmp.eq.s32.totalorder %v100_v18, 2 }
  0x2b   :  { %v105_v21 = vsel %vm102_vm0, %v104_v20, 0.0  ;;  %v112_v24 = vsel %vm109_vm2, %v111_v23, 0.0  ;;  %v119_v29 = vsel %vm116_vm4, %v118_v28, 0.0  ;;  %v231_v61 = vunpack.c.0.s8 %v230_v60  ;;  %p347_p3 = pnand %p346_p2, %p340_p13 }
  0x2c   :  { %vm103_vm1 = vcmp.eq.s32.totalorder %v101_v19, 0  ;;  %vm110_vm3 = vcmp.eq.s32.totalorder %v101_v19, 1  ;;  %vm117_vm5 = vcmp.eq.s32.totalorder %v101_v19, 2  ;;  %v114_v26 = vadd.f32 %v112_v24, %v105_v21 }
  0x2d   :  { %v106_v22 = vsel %vm103_vm1, %v104_v20, 0.0  ;;  %v113_v25 = vsel %vm110_vm3, %v111_v23, 0.0  ;;  %v120_v30 = vsel %vm117_vm5, %v118_v28, 0.0  ;;  %v234_v62 = vsub.s32 %v231_v61, %v408_v13 }
  0x2e   :  { %v115_v27 = vadd.f32 %v113_v25, %v106_v22  ;;  %v121_v31 = vadd.f32 %v119_v29, %v114_v26 }
  0x30   :  { %v122_v32 = vadd.f32 %v120_v30, %v115_v27 }
  0x32   :  { %v289_v34 = vpack.c.bf16 %v122_v32, %v121_v31 }
  0x34   :  { %290 = vmatpush3.bf16.msra.mxu0 %v289_v34 }
  0xb2   :  { %v83_v37 = vpop.xlane.xlu1 %82 }
  0xb3   :  { %v79_v38 = vpop.xlane.xlu0 %78  ;;  %v88_v40 = vmul.f32 0.00390625, %v83_v37 }
  0xb4   :  { %v86_v42 = vmul.f32 0.00390625, %v79_v38 }
  0xb5   :  { %v141_v47 = vrot.slane %v88_v40, %v129_v39 }
  0xb6   :  { %v85_v43 = vpop.xlane.xlu1 %84  ;;  %v130_v49 = vrot.slane %v86_v42, %v129_v39 }
  0xb7   :  { %v89_v44 = vmul.f32 0.00390625, %v85_v43  ;;  %v81_v45 = vpop.xlane.xlu0 %80 }
  0xb8   :  { %v87_v46 = vmul.f32 0.00390625, %v81_v45 }
  0xb9   :  { %v145_v48 = vrot.slane %v89_v44, %v134_v41 }
  0xba   :  { %v135_v50 = vrot.slane %v87_v46, %v134_v41 }
  0xbb   :  { %v146_v51 = vsel %vm136_vm7, %v145_v48, %v141_v47 }
  0xbc   :  { %v137_v52 = vsel %vm136_vm7, %v135_v50, %v130_v49 }
  0xbd   :  { %v148_v53 = vsel %vm147_vm8, %v146_v51, %v137_v52 }
  0xbe   :  { %286 = vmatmul.mubr.msk.f32.vlgmr.msra.gmra.mrb[0].mxu0 %vm149_vm9, %v148_v53 }
 0x191   :  { %v218_v54 = vpop.f32.mrb[0].mxu0 }
 0x192   :  { %v277_v55 = vmul.f32 -1.442695, %v218_v54  ;;  %v287_v56 = vpop.f32.mrb[1].mxu0 }
 0x194   :  { %301 = vpow2.f32 %v277_v55 }
 0x19e   :  { %v302_v57 = vpop.eup %301 }
 0x19f   :  { %v225_v58 = vadd.f32 1.0, %v302_v57 }
 0x1a1   :  { %303 = vrcp.f32 %v225_v58 }
 0x1ab   :  { %v304_v63 = vpop.eup %303 }
 0x1ac   :  { %v235_v0 = vrot.slane %v304_v63, %v234_v62 }
 0x1ae   :  { %v236_v1 = vcombine.high %v235_v0, %v235_v0  ;;  %v243_v2 = vrot.slane %v235_v0, %v234_v62 }
 0x1b0   :  { %v250_v3 = vrot.slane %v236_v1, %v234_v62  ;;  %254 = vst.msk [vmem:[#allocation8] sm:$0x1] %vm253_vm10, %v243_v2 }
 0x1b2   :  { %255 = vst.msk [vmem:[#allocation8 + $0x1] sm:$0x1] %vm253_vm10, %v250_v3 }
 0x1b3   :  { %350 = shalt.err (!%p347_p3)
}
 0x1b4   :  { %s351_s6 = scalar_lea.hbm %s431_s2, 32 }
 0x1b5   :  { %p352_p4 = scmp.ne.s32.totalorder %s431_s2, %s351_s6  ;;  %p355_p5 = scmp.lt.u32.totalorder %s351_s6, %s431_s2 }
 0x1b7   :  { %p357_p6 = pnand %p355_p5, %p352_p4 }
 0x1b9   :  { %360 = shalt.err (!%p357_p6)
}
 0x1ba   :  { %s376_s11 = smov 1  }
 0x1bb   :  { %267 = dma.vmem_to_hbm [thread:$0]  %s262_s30, 32, %s431_s2, [#allocation5], %s369_s22, %s369_s22, %s376_s11  }
 0x1bc   :  { %365 = dma.done.wait [#allocation5], 32  }
 0x1bd   :  { %366 = vsyncadd [#allocation5], 4294967264 }
 0x1be   :  { %271 = vsyncpa [#allocation4], 1 }
 0x1bf   :  { %272 = vsyncpa [#allocation5], 1 }
 0x1c0   :  { %273 = vsyncpa [#allocation6], 1 }

</bundles_post_ra>
